<compile_context>
chip_gen: v7x
topology: tpu7x:2x2x1
jax: 0.10.0
libtpu: 0.0.40
codegen_flags: <defaults>
</compile_context>

<pallas_src>
import functools
import math

import jax
import jax.numpy as jnp
from jax.experimental import pallas as pl
from jax.experimental.pallas import tpu as pltpu


# ----------------------------------------------------------------------------
# Fused single-pass kernel: pool -> fc1 -> relu -> fc2 -> relu -> sigmoid -> scale
# ----------------------------------------------------------------------------
def _se_fused_kernel(x_ref, w1t_ref, w2t_ref, o_ref, *, inv_hw):
    # x_ref/o_ref: (Bt, C, HW)   w1t_ref: (C, C//r)   w2t_ref: (C//r, C)
    # Squeeze: global average pool, f32 accumulation without materializing a
    # full f32 copy of the streamed block.
    y = jnp.sum(x_ref[...], axis=-1, dtype=jnp.float32) * inv_hw          # (Bt, C)

    # Excitation: fc1 -> ReLU -> fc2 -> ReLU -> Sigmoid (f32 on MXU/EUP).
    h = jnp.maximum(
        jnp.dot(y, w1t_ref[...], preferred_element_type=jnp.float32), 0.0)
    z = jnp.maximum(
        jnp.dot(h, w2t_ref[...], preferred_element_type=jnp.float32), 0.0)
    s = jax.nn.sigmoid(z).astype(x_ref.dtype)                             # (Bt, C)

    # Scale: per-channel gate broadcast over the spatial (lane) axis.
    o_ref[...] = (x_ref[...] * s[:, :, None]).astype(o_ref.dtype)


# ----------------------------------------------------------------------------
# Two-phase fallback (per-image slab too big for VMEM): phase 1 = pooled gate.
# ----------------------------------------------------------------------------
def _pool_gate_kernel(x_ref, w1t_ref, w2t_ref, gate_ref, acc_ref, *,
                      inv_hw, hw, hw_blk):
    # x_ref: (Bt, C, HWblk)  gate_ref: (Bt, C, 1)  acc_ref: (Bt, C) f32 scratch
    j = pl.program_id(1)

    @pl.when(j == 0)
    def _():
        acc_ref[...] = jnp.zeros_like(acc_ref)

    # Mask the tail of a partial last spatial tile (OOB lanes are unspecified).
    lane = jax.lax.broadcasted_iota(jnp.int32, x_ref.shape, dimension=2)
    valid = lane < (hw - j * hw_blk)
    acc_ref[...] += jnp.sum(jnp.where(valid, x_ref[...], 0),
                            axis=-1, dtype=jnp.float32)

    @pl.when(j == pl.num_programs(1) - 1)
    def _():
        y = acc_ref[...] * inv_hw
        h = jnp.maximum(
            jnp.dot(y, w1t_ref[...], preferred_element_type=jnp.float32), 0.0)
        z = jnp.maximum(
            jnp.dot(h, w2t_ref[...], preferred_element_type=jnp.float32), 0.0)
        gate_ref[...] = jax.nn.sigmoid(z)[:, :, None].astype(gate_ref.dtype)


def _scale_kernel(gate_ref, x_ref, o_ref):
    # gate_ref: (Bt, C, 1)   x_ref/o_ref: (Bt, C, HWblk)
    o_ref[...] = (x_ref[...] * gate_ref[...]).astype(o_ref.dtype)


# ----------------------------------------------------------------------------
# Wrapper
# ----------------------------------------------------------------------------
def se_layer(x, w1, w2, *, block_batch=None, hw_block=None, force_two_phase=False):
    """x: (B, C, H, W); w1: (C//r, C) [fc_1.weight]; w2: (C, C//r) [fc_2.weight]."""
    b, c, h, w = x.shape
    hw = h * w
    mid = w1.shape[0]
    itemsize = jnp.dtype(x.dtype).itemsize

    # NCHW -> (B, C, HW) is a free reshape (no transpose traffic).
    x_flat = x.reshape(b, c, hw)
    # Pre-transposed Linear weights so the in-kernel matmuls need no transpose.
    w1t = jnp.transpose(w1)   # (C, C//r)
    w2t = jnp.transpose(w2)   # (C//r, C)
    weight_bytes = (w1t.size + w2t.size) * jnp.dtype(w1t.dtype).itemsize

    # Per-generation VMEM-derived budgets.
    try:
        vmem_cap = int(pltpu.get_tpu_info().vmem_capacity_bytes)
    except Exception:
        vmem_cap = 64 << 20                      # conservative (v7x-sized) default
    slab_bytes = vmem_cap // 5                   # ~12 MiB @ 64 MiB, ~25 MiB @ 128 MiB
    target_block_bytes = min(8 << 20, slab_bytes)  # block-byte target (~2-8 MiB)
    vmem_cap_limit = (vmem_cap * 7) // 8         # leave headroom for Mosaic scratch

    per_image_bytes = c * hw * itemsize
    two_phase = bool(force_two_phase) or per_image_bytes > slab_bytes

    inv_hw = 1.0 / float(hw)

    if not two_phase:
        # -------- fused single pass over batch tiles --------
        if block_batch is None:
            bt = max(1, min(b, target_block_bytes // max(per_image_bytes, 1)))
            # Give both v7x TensorCores work when possible (no-op on v5e/v6e).
            if b >= 2 and pl.cdiv(b, bt) < 2:
                bt = pl.cdiv(b, 2)
        else:
            bt = max(1, min(int(block_batch), b))
        grid_b = pl.cdiv(b, bt)                  # partial last block is fine

        block_bytes = bt * c * hw * itemsize
        vmem_limit = int(min(4 * block_bytes + 2 * weight_bytes + (4 << 20),
                             vmem_cap_limit))
        vmem_limit = max(vmem_limit, min(16 << 20, vmem_cap_limit))

        kernel = functools.partial(_se_fused_kernel, inv_hw=inv_hw)
        out_flat = pl.pallas_call(
            kernel,
            out_shape=jax.ShapeDtypeStruct((b, c, hw), x.dtype),
            grid=(grid_b,),
            in_specs=[
                pl.BlockSpec((bt, c, hw), lambda i: (i, 0, 0)),
                pl.BlockSpec((c, mid), lambda i: (0, 0)),   # weights: loaded once,
                pl.BlockSpec((mid, c), lambda i: (0, 0)),   # VMEM-resident
            ],
            out_specs=pl.BlockSpec((bt, c, hw), lambda i: (i, 0, 0)),
            compiler_params=pltpu.CompilerParams(
                dimension_semantics=("parallel",),
                vmem_limit_bytes=vmem_limit,
            ),
            cost_estimate=pl.CostEstimate(
                flops=int(4 * b * c * mid + 2 * b * c * hw),
                transcendentals=int(b * c),
                bytes_accessed=int(2 * b * c * hw * itemsize + 2 * weight_bytes),
            ),
        )(x_flat, w1t, w2t)
        return out_flat.reshape(b, c, h, w)

    # -------- two-phase HW-tiled fallback (huge per-image slabs) --------
    if hw_block is None:
        hw_blk = max(128, (slab_bytes // max(c * itemsize, 1)) // 128 * 128)
    else:
        hw_blk = max(1, int(hw_block))
    hw_blk = min(hw_blk, hw)
    if hw_blk < hw and hw_blk % 128 != 0:
        hw_blk = max(128, (hw_blk // 128) * 128)   # lane axis: multiple of 128 or full
    n_hw = pl.cdiv(hw, hw_blk)

    row_bytes = c * hw_blk * itemsize
    if block_batch is None:
        bt = max(1, min(b, target_block_bytes // max(row_bytes, 1)))
        if b >= 2 and pl.cdiv(b, bt) < 2:
            bt = pl.cdiv(b, 2)
    else:
        bt = max(1, min(int(block_batch), b))
    grid_b = pl.cdiv(b, bt)

    block_bytes = bt * c * hw_blk * itemsize
    vmem_limit = int(min(4 * block_bytes + 2 * weight_bytes + 8 * bt * c + (4 << 20),
                         vmem_cap_limit))
    vmem_limit = max(vmem_limit, min(16 << 20, vmem_cap_limit))

    # Phase 1: pooled sum over HW tiles -> gate (sigmoid(MLP(mean))) of shape (B, C, 1).
    pool_kernel = functools.partial(_pool_gate_kernel, inv_hw=inv_hw,
                                    hw=hw, hw_blk=hw_blk)
    gate = pl.pallas_call(
        pool_kernel,
        out_shape=jax.ShapeDtypeStruct((b, c, 1), x.dtype),
        grid=(grid_b, n_hw),                      # reduction (HW) axis last
        in_specs=[
            pl.BlockSpec((bt, c, hw_blk), lambda i, j: (i, 0, j)),
            pl.BlockSpec((c, mid), lambda i, j: (0, 0)),
            pl.BlockSpec((mid, c), lambda i, j: (0, 0)),
        ],
        out_specs=pl.BlockSpec((bt, c, 1), lambda i, j: (i, 0, 0)),
        scratch_shapes=[pltpu.VMEM((bt, c), jnp.float32)],
        compiler_params=pltpu.CompilerParams(
            dimension_semantics=("parallel", "arbitrary"),
            vmem_limit_bytes=vmem_limit,
        ),
        cost_estimate=pl.CostEstimate(
            flops=int(b * c * hw + 4 * b * c * mid),
            transcendentals=int(b * c),
            bytes_accessed=int(b * c * hw * itemsize + 2 * weight_bytes
                               + b * c * itemsize),
        ),
    )(x_flat, w1t, w2t)

    # Phase 2: stream-scale with the precomputed per-channel gate.
    out_flat = pl.pallas_call(
        _scale_kernel,
        out_shape=jax.ShapeDtypeStruct((b, c, hw), x.dtype),
        grid=(grid_b, n_hw),
        in_specs=[
            pl.BlockSpec((bt, c, 1), lambda i, j: (i, 0, 0)),
            pl.BlockSpec((bt, c, hw_blk), lambda i, j: (i, 0, j)),
        ],
        out_specs=pl.BlockSpec((bt, c, hw_blk), lambda i, j: (i, 0, j)),
        compiler_params=pltpu.CompilerParams(
            dimension_semantics=("parallel", "parallel"),
            vmem_limit_bytes=vmem_limit,
        ),
        cost_estimate=pl.CostEstimate(
            flops=int(b * c * hw),
            transcendentals=0,
            bytes_accessed=int(2 * b * c * hw * itemsize + b * c * itemsize),
        ),
    )(gate, x_flat)
    return out_flat.reshape(b, c, h, w)


# ----------------------------------------------------------------------------
# Test helpers
# ----------------------------------------------------------------------------
def _init_linear_weight(key, out_features, in_features):
    # Matches nn.Linear default init: U(-1/sqrt(fan_in), 1/sqrt(fan_in)).
    bound = 1.0 / math.sqrt(in_features)
    return jax.random.uniform(
        key, (out_features, in_features), dtype=jnp.float32,
        minval=-bound, maxval=bound)


def _se_reference(x, w1, w2):
    # Pure-JAX reference for correctness checking (mirrors the PyTorch module).
    y = jnp.mean(x, axis=(2, 3))                    # (B, C)
    y = jnp.maximum(y @ w1.T, 0.0)                  # (B, C//r)
    y = jnp.maximum(y @ w2.T, 0.0)                  # (B, C)  (re_2 before sigmoid, as in the module)
    s = jax.nn.sigmoid(y)
    return x * s[:, :, None, None]


if __name__ == "__main__":
    key = jax.random.PRNGKey(0)
    k_x, k_w1, k_w2, k_x2 = jax.random.split(key, 4)

    # Small shapes consistent with the module (channel must be >= reduction).
    batch, channel, spatial, reduction = 4, 64, 10, 16
    mid = channel // reduction

    x = jax.random.normal(
        k_x, (batch, channel, spatial, spatial), dtype=jnp.float32)
    w1 = _init_linear_weight(k_w1, mid, channel)      # fc_1.weight: (C//r, C)
    w2 = _init_linear_weight(k_w2, channel, mid)      # fc_2.weight: (C, C//r)

    ref = _se_reference(x, w1, w2)

    # 1) Default fused path: hw=100 (not a multiple of 128) exercises the
    #    unpadded, masked-tail streaming; auto block selection gives grid>=2.
    out = jax.block_until_ready(se_layer(x, w1, w2))
    assert out.shape == x.shape
    assert jnp.allclose(out, ref, atol=1e-5, rtol=1e-5)

    # 2) Fused path with a partial last batch block (b=4, bt=3 -> grid=(2,)).
    out = jax.block_until_ready(se_layer(x, w1, w2, block_batch=3))
    assert jnp.allclose(out, ref, atol=1e-5, rtol=1e-5)

    # 3) Two-phase HW-tiled fallback, forced at a small shape: hw=144 with
    #    hw_block=128 -> partial last spatial tile (masked in-kernel), bt=3 ->
    #    partial last batch tile.
    spatial2 = 12
    x2 = jax.random.normal(
        k_x2, (batch, channel, spatial2, spatial2), dtype=jnp.float32)
    ref2 = _se_reference(x2, w1, w2)
    out2 = jax.block_until_ready(
        se_layer(x2, w1, w2, block_batch=3, hw_block=128, force_two_phase=True))
    assert out2.shape == x2.shape
    assert jnp.allclose(out2, ref2, atol=1e-5, rtol=1e-5)

    print("KERNEL_OK")
</pallas_src>

<mosaic_0001>
module attributes {stable_mosaic.version = 11 : i64} {
  func.func @_se_fused_kernel(%arg0: i32, %arg1: memref<2x64x100xf32, #tpu.memory_space<vmem>>, %arg2: memref<64x4xf32, #tpu.memory_space<vmem>>, %arg3: memref<4x64xf32, #tpu.memory_space<vmem>>, %arg4: memref<2x64x100xf32, #tpu.memory_space<vmem>>) attributes {dimension_semantics = [#tpu.dimension_semantics<parallel>], iteration_bounds = array<i64: 2>, scalar_prefetch = 0 : i64, scratch_operands = 0 : i64, tpu.core_type = #tpu.core_type<tc>, window_params = [{transform_indices = @transform_0, window_bounds = array<i64: 2, 64, 100>}, {pipeline_mode = #tpu.pipeline_mode<synchronous>, transform_indices = @transform_1, window_bounds = array<i64: 64, 4>}, {pipeline_mode = #tpu.pipeline_mode<synchronous>, transform_indices = @transform_2, window_bounds = array<i64: 4, 64>}, {transform_indices = @transform_3, window_bounds = array<i64: 2, 64, 100>}]} {
    %c0 = arith.constant 0 : index
    %c0_0 = arith.constant 0 : index
    %c0_1 = arith.constant 0 : index
    %0 = vector.load %arg1[%c0, %c0_0, %c0_1] : memref<2x64x100xf32, #tpu.memory_space<vmem>>, vector<2x64x100xf32>
    %cst = arith.constant dense<0.000000e+00> : vector<2x64xf32>
    %1 = vector.multi_reduction <add>, %0, %cst [2] : vector<2x64x100xf32> to vector<2x64xf32>
    %cst_2 = arith.constant 0.00999999977 : f32
    %2 = vector.broadcast %cst_2 : f32 to vector<2x64xf32>
    %3 = arith.mulf %1, %2 : vector<2x64xf32>
    %c0_3 = arith.constant 0 : index
    %c0_4 = arith.constant 0 : index
    %4 = vector.load %arg2[%c0_3, %c0_4] : memref<64x4xf32, #tpu.memory_space<vmem>>, vector<64x4xf32>
    %cst_5 = arith.constant dense<0.000000e+00> : vector<2x4xf32>
    %5 = tpu.matmul %3, %4, %cst_5 {dimension_numbers = #tpu.dot_dimension_numbers<[1], [0], [0], [1], [0, 0, 1, 1], [], []>} : vector<2x64xf32>, vector<64x4xf32>, vector<2x4xf32> -> vector<2x4xf32>
    %cst_6 = arith.constant 0.000000e+00 : f32
    %6 = vector.broadcast %cst_6 : f32 to vector<2x4xf32>
    %7 = arith.maximumf %5, %6 : vector<2x4xf32>
    %c0_7 = arith.constant 0 : index
    %c0_8 = arith.constant 0 : index
    %8 = vector.load %arg3[%c0_7, %c0_8] : memref<4x64xf32, #tpu.memory_space<vmem>>, vector<4x64xf32>
    %cst_9 = arith.constant dense<0.000000e+00> : vector<2x64xf32>
    %9 = tpu.matmul %7, %8, %cst_9 {dimension_numbers = #tpu.dot_dimension_numbers<[1], [0], [0], [1], [0, 0, 1, 1], [], []>} : vector<2x4xf32>, vector<4x64xf32>, vector<2x64xf32> -> vector<2x64xf32>
    %cst_10 = arith.constant 0.000000e+00 : f32
    %10 = vector.broadcast %cst_10 : f32 to vector<2x64xf32>
    %11 = arith.maximumf %9, %10 : vector<2x64xf32>
    %12 = arith.negf %11 : vector<2x64xf32>
    %13 = math.exp %12 : vector<2x64xf32>
    %cst_11 = arith.constant 1.000000e+00 : f32
    %14 = vector.broadcast %cst_11 : f32 to vector<2x64xf32>
    %15 = arith.addf %14, %13 : vector<2x64xf32>
    %16 = arith.divf %14, %15 : vector<2x64xf32>
    %c0_12 = arith.constant 0 : index
    %c0_13 = arith.constant 0 : index
    %c0_14 = arith.constant 0 : index
    %17 = vector.load %arg1[%c0_12, %c0_13, %c0_14] : memref<2x64x100xf32, #tpu.memory_space<vmem>>, vector<2x64x100xf32>
    %18 = vector.shape_cast %16 : vector<2x64xf32> to vector<2x64x1xf32>
    %19 = vector.broadcast %18 : vector<2x64x1xf32> to vector<2x64x100xf32>
    %20 = arith.mulf %17, %19 : vector<2x64x100xf32>
    %c0_15 = arith.constant 0 : index
    %c0_16 = arith.constant 0 : index
    %c0_17 = arith.constant 0 : index
    %21 = vector.load %arg4[%c0_15, %c0_16, %c0_17] : memref<2x64x100xf32, #tpu.memory_space<vmem>>, vector<2x64x100xf32>
    tpu.vector_store %arg4[%c0_15, %c0_16, %c0_17], %20 {strides = array<i32>} : memref<2x64x100xf32, #tpu.memory_space<vmem>>, vector<2x64x100xf32>,
    return
  }
  func.func @transform_0(%arg0: i32) -> (i32, i32, i32) {
    %c0_i32 = arith.constant 0 : i32
    %c0_i32_0 = arith.constant 0 : i32
    %c0_i32_1 = arith.constant 0 : i32
    return %arg0, %c0_i32, %c0_i32_0 : i32, i32, i32
  }
  func.func @transform_1(%arg0: i32) -> (i32, i32) {
    %c0_i32 = arith.constant 0 : i32
    %c0_i32_0 = arith.constant 0 : i32
    %c0_i32_1 = arith.constant 0 : i32
    return %c0_i32, %c0_i32_0 : i32, i32
  }
  func.func @transform_2(%arg0: i32) -> (i32, i32) {
    %c0_i32 = arith.constant 0 : i32
    %c0_i32_0 = arith.constant 0 : i32
    %c0_i32_1 = arith.constant 0 : i32
    return %c0_i32, %c0_i32_0 : i32, i32
  }
  func.func @transform_3(%arg0: i32) -> (i32, i32, i32) {
    %c0_i32 = arith.constant 0 : i32
    %c0_i32_0 = arith.constant 0 : i32
    %c0_i32_1 = arith.constant 0 : i32
    return %arg0, %c0_i32, %c0_i32_0 : i32, i32, i32
  }
}

</mosaic_0001>

<bundles_post_ra>
// kernel: tpu_custom_call.1
= control target key start
LH: loop header
LB: loop body
LE: loop exit
PB: predicated region body
PF: predicated region fallthrough
CT: control target
= control target key end

     0   :  { %8 = vsyncpa [#allocation3], 0  ;;  %s1348_s0 = inlined_call_operand.hbm [shape: f32[4,64,100], index: 0, kind: input, shape index: {}]   ;;  %s1349_s1 = inlined_call_operand.vmem [shape: f32[64,4], index: 1, kind: input, shape index: {}]   ;;  %s1350_s2 = inlined_call_operand.vmem [shape: f32[4,64], index: 2, kind: input, shape index: {}]   ;;  %s1351_s3 = inlined_call_operand.hbm [shape: f32[4,64,100], index: 3, kind: output, shape index: {}]  }
   0x1   :  { %10 = vsyncpa [#allocation3 + $0x1], 0 }
   0x2   :  { %11 = vsyncpa [#allocation4], 0 }
   0x3   :  { %13 = vsyncpa [#allocation4 + $0x1], 0  ;;  %s998_s12 = smov 0   ;;  %s1000_s13 = smov 0  }
   0x4   :  { %s1002_s14 = smov 0   ;;  %s1004_s15 = smov 0  }
   0x5 LB: > { %s1019_s16 = sadd.s32 4294967295, %s967_s15   ;;  %s743_s17 = sadd.s32 4294967294, %s967_s15   ;;  %s967_s15 = sphi %s1004_s15, %s1364_s15   ;;  %s963_s14 = sphi %s1002_s14, %s1363_s14   ;;  %s959_s13 = sphi %s1000_s13, %s1362_s13   ;;  %s955_s12 = sphi %s998_s12, %s1361_s12  }
   0x6   : > { %s1023_s18 = sadd.s32 1, %s967_s15   ;;  %s26_s19 = sadd.s32 1, %s963_s14 }
   0x7   : > { %s23_s20 = ssub.s32 %s967_s15, %s1023_s18  ;;  %p33_p0 = scmp.ne.s32.totalorder %s963_s14, %s959_s13 }
   0x8   : > { %p24_p1 = scmp.eq.s32.totalorder %s23_s20, 0  ;;  %p34_p2 = scmp.eq.s32.totalorder %s967_s15, 0 }
   0x9   : > { %p39_p3 = scmp.ne.s32.totalorder %s959_s13, %s955_s12  ;;  %p40_p4 = scmp.eq.s32.totalorder %s1019_s16, 0 }
   0xa   : > { %s1035_s21 = scalar_select %p24_p1, %s963_s14, %s26_s19  }
   0xb   : > { %p1037_p5 = por %p34_p2, %p33_p0  ;;  %p1041_p6 = por %p40_p4, %p39_p3 }
   0xc   : > { %p105_p7 = scmp.eq.s32.totalorder %s1019_s16, 1  ;;  %p111_p8 = scmp.eq.s32.totalorder %s743_s17, 1 }
   0xd   : > { %p826_p10 = scmp.lt.s32.totalorder %s967_s15, 2  ;;  %s137_s26 = sand.u32 1, %s963_s14  }
   0xe   : > { %p1048_p11 = por %p105_p7, %p33_p0  ;;  %p1052_p12 = por %p111_p8, %p39_p3 }
   0xf   : > { %s764_s27 = sshll.u32 %s967_s15, 11  ;;  %s746_s28 = sshll.u32 %s137_s26, 7 }
  0x10   : > { %s1355_s24 = scalar_select %p1048_p11, 1, 0 }
  0x11   : > { %s1356_s25 = scalar_select %p1052_p12, 1, 0 }
  0x12   : > { %s1061_s4 = scalar_lea.hbm %s1348_s0, %s764_s27  ;;  %s141_s5 = scalar_lea.vmem [#allocation2], %s746_s28 }
  0x13   : > { %s149_s6 = sshll.u32 %s141_s5, 4  ;;  %p1065_p13 = pnand %p826_p10, %p1037_p5  ;;  %s1069_s6 = int_to_ptr.vmem [resolvable:$true] %s149_s6 }
  0x14   : > { %s1071_s8 = scalar_lea.sflag [#allocation3], %s137_s26  ;;  %s871_s9 = scalar_lea.hbm %s1061_s4, 2048 }
  0x15   : > { %p872_p0 = scmp.ne.s32.totalorder %s1061_s4, %s871_s9  ;;  %p873_p1 = pneg %p1065_p13 }
  0x16   : > { %s876_s17 = scalar_lea.hbm %s1348_s0, 4096  ;;  %p877_p4 = scmp.lt.u32.totalorder %s1061_s4, %s1348_s0 }
  0x17   : > { %p874_p2 = pnand %p873_p1, %p872_p0  ;;  %p878_p5 = scmp.lt.u32.totalorder %s876_s17, %s871_s9 }
  0x18   : > { %p880_p8 = scmp.lt.u32.totalorder %s871_s9, %s1061_s4 }
  0x19   : > { %p875_p3 = pneg %p874_p2  ;;  %p879_p7 = por %p878_p5, %p877_p4 }
  0x1b   : > { %p881_p10 = por %p880_p8, %p879_p7 }
  0x1d   : > { %p882_p9 = pnand %p881_p10, %p875_p3 }
  0x1f   : > { %885 = shalt.err (!%p882_p9)
}
  0x20   : > { %s886_s22 = scalar_lea.vmem %s1069_s6, 2048  ;;  %s969_s26 = smov [#allocation2]  }
  0x21   : > { %p887_p0 = scmp.ne.s32.totalorder %s1069_s6, %s886_s22  ;;  %s891_s27 = sshll.u32 %s969_s26, 4  ;;  %s892_s27 = int_to_ptr.vmem [resolvable:$false] %s891_s27 }
  0x22   : > { %s893_s28 = scalar_lea.vmem %s892_s27, 4096  ;;  %p894_p11 = scmp.lt.s32.totalorder %s1069_s6, %s892_s27 }
  0x23   : > { %p889_p2 = pnand %p887_p0, %p873_p1  ;;  %p895_p4 = scmp.lt.s32.totalorder %s893_s28, %s886_s22 }
  0x25   : > { %p890_p12 = pneg %p889_p2  ;;  %p896_p5 = por %p895_p4, %p894_p11 }
  0x27   : > { %p897_p7 = pnand %p896_p5, %p890_p12 }
  0x29   : > { %900 = shalt.err (!%p897_p7)
}
  0x2a   : > { %s970_s29 = smov 128   ;;  %s971_s30 = smov 8  }
  0x2b   : > { %821 = dma.hbm_to_vmem [thread:$0]  (!%p1065_p13), %s1061_s4, 2048, %s1069_s6, %s1071_s8, %s970_s29, %s970_s29, %s971_s30  }
  0x2c   : > { %p750_p9 = scmp.ge.s32.totalorder %s967_s15, 1  ;;  %p157_p1 = scmp.lt.s32.totalorder %s967_s15, 3 }
  0x2e   : > { %p158_p3 = pnand %p750_p9, %p157_p1 }
  0x2f   : > { %s1102_s5 = sand.u32 (!%p158_p3), 1, %s959_s13  }
  0x30   : > { %161 = sbr.rel (%p158_p3) target bundleno = 855 (0x357), region = 32  ;;  %s751_s9 = sshll.u32 (!%p158_p3), %s1102_s5, 7 }
  0x31   : > { %s164_s10 = scalar_lea.sflag (!%p158_p3), [#allocation3], %s1102_s5  ;;  %s1108_s11 = scalar_lea.vmem (!%p158_p3), [#allocation2], %s751_s9 }
  0x37   : > { %946 = dma.done.wait (%p1041_p6), %s164_s10, 2048  }
  0x38   : > { %948 = vsyncadd (%p1041_p6), %s164_s10, 4294965248  ;;  %vm208_vm0 = vcmask 818176   ;;  %v1115_v0 = vld [vmem:[%s1108_s11 + $0x40] sm:$0xff]  ;;  %v1121_v2 = vld [vmem:[%s1108_s11 + $0x48] sm:$0xff]  ;;  %v972_v35 = vmov 0.0|0.0   ;;  %vm973_vm1 = vmmov 0   ;;  %v297_v50 = vlaneseq }
  0x39   : > { %v1118_v1 = vld [vmem:[%s1108_s11] sm:$0xff]  ;;  %v233_v3 = vsel %vm208_vm0, %v1115_v0, 0.0  ;;  %v1128_v5 = vld [vmem:[%s1108_s11 + $0x8] sm:$0xff]  ;;  %v236_v6 = vsel %vm208_vm0, %v1121_v2, 0.0  ;;  %v1135_v8 = vld [vmem:[%s1108_s11 + $0x50] sm:$0xff]  ;;  %802 = vmatprep.subr.bf16.mxu0 %v972_v35  ;;  %v974_v45 = vmov 0.0  }
  0x3a   : > { %v209_v4 = vsel %vm208_vm0, %v1118_v1, 0.0  ;;  %234 = vadd.xlane.f32.xlu1 %v233_v3  ;;  %v212_v7 = vsel %vm208_vm0, %v1128_v5, 0.0  ;;  %v1138_v9 = vld [vmem:[%s1108_s11 + $0x10] sm:$0xff]  ;;  %v239_v10 = vsel %vm208_vm0, %v1135_v8, 0.0  ;;  %v1145_v12 = vld [vmem:[%s1108_s11 + $0x58] sm:$0xff]  ;;  %v1155_v16 = vld [vmem:[%s1108_s11 + $0x60] sm:$0xff]  ;;  %794 = vmatprep.mubr.msk.f32.mxu0 %vm973_vm1, %v974_v45 }
  0x3b   : > { %210 = vadd.xlane.f32.xlu0 %v209_v4  ;;  %v215_v11 = vsel %vm208_vm0, %v1138_v9, 0.0  ;;  %v1148_v13 = vld [vmem:[%s1108_s11 + $0x18] sm:$0xff]  ;;  %v242_v14 = vsel %vm208_vm0, %v1145_v12, 0.0  ;;  %v1158_v17 = vld [vmem:[%s1108_s11 + $0x20] sm:$0xff]  ;;  %v245_v18 = vsel %vm208_vm0, %v1155_v16, 0.0  ;;  %v1165_v20 = vld [vmem:[%s1108_s11 + $0x68] sm:$0xff]  ;;  %797 = vmatprep.subr.mxu1 %v974_v45 }
  0x3c   : > { %v218_v15 = vsel %vm208_vm0, %v1148_v13, 0.0  ;;  %v221_v19 = vsel %vm208_vm0, %v1158_v17, 0.0  ;;  %v1168_v21 = vld [vmem:[%s1108_s11 + $0x28] sm:$0xff]  ;;  %v248_v22 = vsel %vm208_vm0, %v1165_v20, 0.0  ;;  %v1175_v24 = vld [vmem:[%s1108_s11 + $0x70] sm:$0xff]  ;;  %v1185_v28 = vld [vmem:[%s1108_s11 + $0x78] sm:$0xff]  ;;  %799 = vmatprep.mubr.msk.f32.mxu1 %vm973_vm1, %v974_v45 }
  0x3d   : > { %v224_v23 = vsel %vm208_vm0, %v1168_v21, 0.0  ;;  %v1178_v25 = vld [vmem:[%s1108_s11 + $0x30] sm:$0xff]  ;;  %v251_v26 = vsel %vm208_vm0, %v1175_v24, 0.0  ;;  %v1188_v29 = vld [vmem:[%s1108_s11 + $0x38] sm:$0xff]  ;;  %v254_v30 = vsel %vm208_vm0, %v1185_v28, 0.0  ;;  %v273_v32 = vld [vmem:[%s1349_s1] sm:$0xff] }
  0x3e   : > { %237 = vadd.xlane.f32.xlu1 %v236_v6  ;;  %v227_v27 = vsel %vm208_vm0, %v1178_v25, 0.0  ;;  %v230_v31 = vsel %vm208_vm0, %v1188_v29, 0.0  ;;  %v274_v33 = vld [vmem:[%s1349_s1 + $0x8] sm:$0xff]  ;;  %v275_v36 = vld [vmem:[%s1349_s1 + $0x10] sm:$0xff]  ;;  %v276_v37 = vld [vmem:[%s1349_s1 + $0x18] sm:$0xff]  ;;  %v298_v53 = vand.u32 127, %v297_v50 }
  0x3f   : > { %213 = vadd.xlane.f32.xlu0 %v212_v7  ;;  %v803_v34 = vpack.c.bf16 %v274_v33, %v273_v32  ;;  %v806_v38 = vpack.c.bf16 %v276_v37, %v275_v36  ;;  %v277_v39 = vld [vmem:[%s1349_s1 + $0x20] sm:$0xff]  ;;  %v278_v40 = vld [vmem:[%s1349_s1 + $0x28] sm:$0xff]  ;;  %v279_v42 = vld [vmem:[%s1349_s1 + $0x30] sm:$0xff]  ;;  %v1218_v56 = vshrl.u32 %v297_v50, 7  ;;  %vm308_vm2 = vcmask 130112   ;;  %s1249_s6 = scalar_lea.vmem [#allocation5], %s751_s9 }
  0x40   : > { %v809_v41 = vpack.c.bf16 %v278_v40, %v277_v39  ;;  %v280_v43 = vld [vmem:[%s1349_s1 + $0x38] sm:$0xff]  ;;  %v303_v57 = vadd.s32 4294967288, %v298_v53  ;;  %v310_v58 = vadd.s32 4294967280, %v298_v53  ;;  %v317_v59 = vadd.s32 4294967272, %v298_v53  ;;  %s766_s9 = sshll.u32 %s1019_s16, 11  ;;  %s670_s7 = sshll.u32 %s1249_s6, 4  ;;  %s1301_s7 = int_to_ptr.vmem [resolvable:$true] %s670_s7 }
  0x41   : > { %804 = vmatpush3.bf16.msra.mxu0 %v803_v34  ;;  %v812_v44 = vpack.c.bf16 %v280_v43, %v279_v42  ;;  %v324_v60 = vadd.s32 4294967264, %v298_v53  ;;  %v301_v63 = vsub.s32 %v298_v53, %v1218_v56  ;;  %v331_v4 = vadd.s32 4294967256, %v298_v53  ;;  %s1299_s19 = scalar_lea.hbm %s1351_s3, %s766_s9  ;;  %s656_s20 = scalar_lea.sflag [#allocation4], %s1102_s5 }
  0x42   : > { %240 = vadd.xlane.f32.xlu1 %v239_v10  ;;  %805 = vmatprep.subr.bf16.mxu0 %v972_v35  ;;  %v306_v3 = vsub.s32 %v303_v57, %v1218_v56  ;;  %v313_v6 = vsub.s32 %v310_v58, %v1218_v56  ;;  %vm315_vm3 = vcmask 195712   ;;  %vm322_vm4 = vcmask 261312   ;;  %s901_s16 = scalar_lea.vmem %s1301_s7, 2048  ;;  %p1358_p11 = scmp.ne.s32.totalorder %s1355_s24, 0 }
  0x43   : > { %216 = vadd.xlane.f32.xlu0 %v215_v11  ;;  %v338_v7 = vadd.s32 4294967248, %v298_v53  ;;  %vm329_vm5 = vcmask 326912   ;;  %v334_v32 = vsub.s32 %v331_v4, %v1218_v56  ;;  %vm336_vm6 = vcmask 392512   ;;  %p902_p6 = scmp.ne.s32.totalorder %s1301_s7, %s901_s16  ;;  %s975_s22 = smov [#allocation5]  }
  0x44   : > { %v345_v36 = vadd.s32 4294967240, %v298_v53  ;;  %vm343_vm7 = vcmask 458112   ;;  %vm350_vm8 = vcmask 523712   ;;  %vm391_vm9 = vcmask 1041409   ;;  %s905_s26 = sshll.u32 %s975_s22, 4  ;;  %s906_s26 = int_to_ptr.vmem [resolvable:$false] %s905_s26 }
  0x45   : > { %807 = vmatpush3.bf16.msra.mxu0 %v806_v38  ;;  %vm393_vm10 = vcmask 523264   ;;  %vm472_vm11 = vcmask 1043456   ;;  %vm468_vm12 = vcmask 31744   ;;  %p903_p12 = pnand %p902_p6, %p1358_p11  ;;  %s907_s27 = scalar_lea.vmem %s906_s26, 4096 }
  0x46   : > { %243 = vadd.xlane.f32.xlu1 %v242_v14  ;;  %808 = vmatprep.subr.bf16.mxu0 %v972_v35  ;;  %p908_p8 = scmp.lt.s32.totalorder %s1301_s7, %s906_s26  ;;  %p909_p10 = scmp.lt.s32.totalorder %s907_s27, %s901_s16 }
  0x47   : > { %219 = vadd.xlane.f32.xlu0 %v218_v15  ;;  %v320_v15 = vsub.s32 %v317_v59, %v1218_v56  ;;  %p904_p13 = pneg %p903_p12 }
  0x48   : > { %p910_p0 = por %p909_p10, %p908_p8 }
  0x49   : > { %810 = vmatpush3.bf16.msra.mxu0 %v809_v41 }
  0x4a   : > { %246 = vadd.xlane.f32.xlu1 %v245_v18  ;;  %811 = vmatprep.subr.bf16.mxu0 %v972_v35  ;;  %v341_v35 = vsub.s32 %v338_v7, %v1218_v56  ;;  %p911_p2 = pnand %p910_p0, %p904_p13 }
  0x4b   : > { %222 = vadd.xlane.f32.xlu0 %v221_v19 }
  0x4d   : > { %813 = vmatpush3.bf16.msra.mxu0 %v812_v44 }
  0x4e   : > { %249 = vadd.xlane.f32.xlu1 %v248_v22 }
  0x4f   : > { %225 = vadd.xlane.f32.xlu0 %v224_v23  ;;  %v327_v23 = vsub.s32 %v324_v60, %v1218_v56 }
  0x52   : > { %252 = vadd.xlane.f32.xlu1 %v251_v26 }
  0x53   : > { %228 = vadd.xlane.f32.xlu0 %v227_v27 }
  0x56   : > { %255 = vadd.xlane.f32.xlu1 %v254_v30 }
  0x57   : > { %231 = vadd.xlane.f32.xlu0 %v230_v31 }
  0xc7   : > { %v235_v46 = vpop.xlane.xlu1 %234 }
  0xc8   : > { %v211_v47 = vpop.xlane.xlu0 %210  ;;  %v265_v10 = vmul.f32 0.01, %v235_v46 }
  0xc9   : > { %v257_v18 = vmul.f32 0.01, %v211_v47 }
  0xca   : > { %v355_v41 = vrot.slane %v265_v10, %v301_v63 }
  0xcb   : > { %v238_v48 = vpop.xlane.xlu1 %237  ;;  %v302_v42 = vrot.slane %v257_v18, %v301_v63 }
  0xcc   : > { %v214_v49 = vpop.xlane.xlu0 %213  ;;  %v266_v11 = vmul.f32 0.01, %v238_v48 }
  0xcd   : > { %v258_v14 = vmul.f32 0.01, %v214_v49 }
  0xce   : > { %v359_v37 = vrot.slane %v266_v11, %v306_v3 }
  0xcf   : > { %v241_v51 = vpop.xlane.xlu1 %240  ;;  %v307_v38 = vrot.slane %v258_v14, %v306_v3 }
  0xd0   : > { %v217_v52 = vpop.xlane.xlu0 %216  ;;  %v267_v19 = vmul.f32 0.01, %v241_v51  ;;  %v360_v53 = vsel %vm308_vm2, %v359_v37, %v355_v41 }
  0xd1   : > { %v259_v22 = vmul.f32 0.01, %v217_v52 }
  0xd2   : > { %v364_v43 = vrot.slane %v267_v19, %v313_v6 }
  0xd3   : > { %v244_v54 = vpop.xlane.xlu1 %243  ;;  %v314_v44 = vrot.slane %v259_v22, %v313_v6 }
  0xd4   : > { %v220_v55 = vpop.xlane.xlu0 %219  ;;  %v268_v30 = vmul.f32 0.01, %v244_v54  ;;  %v348_v54 = vsub.s32 %v345_v36, %v1218_v56  ;;  %v365_v59 = vsel %vm315_vm3, %v364_v43, %v360_v53 }
  0xd5   : > { %v260_v31 = vmul.f32 0.01, %v220_v55  ;;  %v309_v55 = vsel %vm308_vm2, %v307_v38, %v302_v42  ;;  %v555_v42 = vsub.s32 0, %v1218_v56 }
  0xd6   : > { %v369_v47 = vrot.slane %v268_v30, %v320_v15  ;;  %v316_v60 = vsel %vm315_vm3, %v314_v44, %v309_v55 }
  0xd7   : > { %v247_v61 = vpop.xlane.xlu1 %246  ;;  %v321_v48 = vrot.slane %v260_v31, %v320_v15 }
  0xd8   : > { %v223_v62 = vpop.xlane.xlu0 %222  ;;  %v269_v33 = vmul.f32 0.01, %v247_v61  ;;  %v370_v4 = vsel %vm322_vm4, %v369_v47, %v365_v59 }
  0xd9   : > { %v261_v34 = vmul.f32 0.01, %v223_v62  ;;  %v323_v6 = vsel %vm322_vm4, %v321_v48, %v316_v60 }
  0xda   : > { %v374_v51 = vrot.slane %v269_v33, %v327_v23 }
  0xdb   : > { %v250_v26 = vpop.xlane.xlu1 %249  ;;  %v328_v52 = vrot.slane %v261_v34, %v327_v23 }
  0xdc   : > { %v226_v27 = vpop.xlane.xlu0 %225  ;;  %v270_v39 = vmul.f32 0.01, %v250_v26  ;;  %v375_v11 = vsel %vm329_vm5, %v374_v51, %v370_v4 }
  0xdd   : > { %v262_v40 = vmul.f32 0.01, %v226_v27  ;;  %v330_v14 = vsel %vm329_vm5, %v328_v52, %v323_v6 }
  0xde   : > { %v379_v57 = vrot.slane %v270_v39, %v334_v32 }
  0xdf   : > { %v253_v45 = vpop.xlane.xlu1 %252  ;;  %v335_v58 = vrot.slane %v262_v40, %v334_v32  ;;  %v467_v32 = vld [vmem:[%s1350_s2] sm:$0xf] }
  0xe0   : > { %v229_v46 = vpop.xlane.xlu0 %228  ;;  %v271_v49 = vmul.f32 0.01, %v253_v45  ;;  %v380_v15 = vsel %vm336_vm6, %v379_v57, %v375_v11  ;;  %798 = vmatpush3.msk.msra.mxu1 %vm472_vm11, %v467_v32  ;;  %v590_v45 = vsub.s32 1, %v1218_v56 }
  0xe1   : > { %v263_v50 = vmul.f32 0.01, %v229_v46  ;;  %v337_v18 = vsel %vm336_vm6, %v335_v58, %v330_v14 }
  0xe2   : > { %v384_v61 = vrot.slane %v271_v49, %v341_v35 }
  0xe3   : > { %v342_v62 = vrot.slane %v263_v50, %v341_v35  ;;  %v256_v63 = vpop.xlane.xlu1 %255 }
  0xe4   : > { %v232_v3 = vpop.xlane.xlu0 %231  ;;  %v272_v7 = vmul.f32 0.01, %v256_v63  ;;  %v385_v23 = vsel %vm343_vm7, %v384_v61, %v380_v15 }
  0xe5   : > { %v264_v10 = vmul.f32 0.01, %v232_v3  ;;  %v344_v26 = vsel %vm343_vm7, %v342_v62, %v337_v18 }
  0xe6   : > { %v389_v19 = vrot.slane %v272_v7, %v348_v54 }
  0xe7   : > { %v349_v22 = vrot.slane %v264_v10, %v348_v54 }
  0xe8   : > { %v390_v30 = vsel %vm350_vm8, %v389_v19, %v385_v23 }
  0xe9   : > { %v351_v27 = vsel %vm350_vm8, %v349_v22, %v344_v26 }
  0xea   : > { %v392_v31 = vsel %vm391_vm9, %v390_v30, %v351_v27 }
  0xeb   : > { %795 = vmatmul.mubr.msk.f32.vlgmr.msra.gmra.mrb[0].mxu0 %vm393_vm10, %v392_v31 }
 0x1be   : > { %v462_v33 = vpop.f32.mrb[0].mxu0 }
 0x1bf   : > { %v466_v34 = vmax.f32 %v462_v33, 0.0  ;;  %v796_v35 = vpop.f32.mrb[1].mxu0 }
 0x1c1   : > { %800 = vmatmul.mubr.msk.f32.vlgmr.msra.gmra.mrb[0].mxu1 %vm468_vm12, %v466_v34 }
 0x294   : > { %v542_v36 = vpop.f32.mrb[0].mxu1 }
 0x295   : > { %v546_v37 = vmax.f32 %v542_v36, 0.0  ;;  %v801_v38 = vpop.f32.mrb[1].mxu1 }
 0x297   : > { %v756_v39 = vmul.f32 -1.442695, %v546_v37 }
 0x299   : > { %867 = vpow2.f32 %v756_v39 }
 0x2a3   : > { %v868_v40 = vpop.eup %867 }
 0x2a4   : > { %v550_v41 = vadd.f32 1.0, %v868_v40 }
 0x2a6   : > { %869 = vrcp.f32 %v550_v41 }
 0x2b0   : > { %v870_v43 = vpop.eup %869 }
 0x2b1   : > { %v556_v44 = vrot.slane %v870_v43, %v555_v42  ;;  %v591_v46 = vrot.slane %v870_v43, %v590_v45 }
 0x2b3   : > { %562 = vbcast.lane.b32.xlu1 %v556_v44, 264  ;;  %558 = vbcast.lane.b32.xlu0 %v556_v44, 256 }
 0x2b7   : > { %566 = vbcast.lane.b32.xlu1 %v556_v44, 272  ;;  %574 = vbcast.lane.b32.xlu0 %v556_v44, 288 }
 0x2bb   : > { %570 = vbcast.lane.b32.xlu1 %v556_v44, 280  ;;  %582 = vbcast.lane.b32.xlu0 %v556_v44, 304 }
 0x2bf   : > { %578 = vbcast.lane.b32.xlu1 %v556_v44, 296  ;;  %593 = vbcast.lane.b32.xlu0 %v591_v46, 256 }
 0x2c3   : > { %586 = vbcast.lane.b32.xlu1 %v556_v44, 312  ;;  %601 = vbcast.lane.b32.xlu0 %v591_v46, 272 }
 0x2c7   : > { %597 = vbcast.lane.b32.xlu1 %v591_v46, 264  ;;  %609 = vbcast.lane.b32.xlu0 %v591_v46, 288 }
 0x2cb   : > { %605 = vbcast.lane.b32.xlu1 %v591_v46, 280  ;;  %617 = vbcast.lane.b32.xlu0 %v591_v46, 304 }
 0x2cf   : > { %613 = vbcast.lane.b32.xlu1 %v591_v46, 296 }
 0x2d3   : > { %621 = vbcast.lane.b32.xlu1 %v591_v46, 312 }
 0x325   : > { %v563_v47 = vpop.permute.xlu1 %562  ;;  %v559_v48 = vpop.permute.xlu0 %558 }
 0x326   : > { %v624_v49 = vmul.f32 %v563_v47, %v1128_v5  ;;  %v623_v56 = vmul.f32 %v559_v48, %v1118_v1 }
 0x328   : > { %640 = vst.msk [vmem:[%s1249_s6 + $0x8] sm:$0xff] %vm208_vm0, %v624_v49  ;;  %639 = vst.msk [vmem:[%s1249_s6] sm:$0xff] %vm208_vm0, %v623_v56 }
 0x329   : > { %v567_v50 = vpop.permute.xlu1 %566  ;;  %v575_v51 = vpop.permute.xlu0 %574 }
 0x32a   : > { %v625_v5 = vmul.f32 %v567_v50, %v1138_v9  ;;  %v627_v1 = vmul.f32 %v575_v51, %v1158_v17 }
 0x32c   : > { %641 = vst.msk [vmem:[%s1249_s6 + $0x10] sm:$0xff] %vm208_vm0, %v625_v5  ;;  %643 = vst.msk [vmem:[%s1249_s6 + $0x20] sm:$0xff] %vm208_vm0, %v627_v1 }
 0x32d   : > { %v571_v52 = vpop.permute.xlu1 %570  ;;  %v583_v54 = vpop.permute.xlu0 %582 }
 0x32e   : > { %v626_v53 = vmul.f32 %v571_v52, %v1148_v13  ;;  %v629_v55 = vmul.f32 %v583_v54, %v1178_v25 }
 0x330   : > { %642 = vst.msk [vmem:[%s1249_s6 + $0x18] sm:$0xff] %vm208_vm0, %v626_v53  ;;  %645 = vst.msk [vmem:[%s1249_s6 + $0x30] sm:$0xff] %vm208_vm0, %v629_v55 }
 0x331   : > { %v579_v57 = vpop.permute.xlu1 %578  ;;  %v594_v9 = vpop.permute.xlu0 %593 }
 0x332   : > { %v628_v17 = vmul.f32 %v579_v57, %v1168_v21  ;;  %v631_v58 = vmul.f32 %v594_v9, %v1115_v0 }
 0x334   : > { %644 = vst.msk [vmem:[%s1249_s6 + $0x28] sm:$0xff] %vm208_vm0, %v628_v17  ;;  %647 = vst.msk [vmem:[%s1249_s6 + $0x40] sm:$0xff] %vm208_vm0, %v631_v58 }
 0x335   : > { %v587_v59 = vpop.permute.xlu1 %586  ;;  %v602_v13 = vpop.permute.xlu0 %601 }
 0x336   : > { %v630_v25 = vmul.f32 %v587_v59, %v1188_v29  ;;  %v633_v60 = vmul.f32 %v602_v13, %v1135_v8 }
 0x338   : > { %646 = vst.msk [vmem:[%s1249_s6 + $0x38] sm:$0xff] %vm208_vm0, %v630_v25  ;;  %649 = vst.msk [vmem:[%s1249_s6 + $0x50] sm:$0xff] %vm208_vm0, %v633_v60 }
 0x339   : > { %v598_v21 = vpop.permute.xlu1 %597  ;;  %v610_v0 = vpop.permute.xlu0 %609 }
 0x33a   : > { %v632_v61 = vmul.f32 %v598_v21, %v1121_v2  ;;  %v635_v62 = vmul.f32 %v610_v0, %v1155_v16 }
 0x33c   : > { %648 = vst.msk [vmem:[%s1249_s6 + $0x48] sm:$0xff] %vm208_vm0, %v632_v61  ;;  %651 = vst.msk [vmem:[%s1249_s6 + $0x60] sm:$0xff] %vm208_vm0, %v635_v62 }
 0x33d   : > { %v606_v29 = vpop.permute.xlu1 %605  ;;  %v618_v8 = vpop.permute.xlu0 %617 }
 0x33e   : > { %v634_v63 = vmul.f32 %v606_v29, %v1145_v12  ;;  %v637_v3 = vmul.f32 %v618_v8, %v1175_v24 }
 0x340   : > { %650 = vst.msk [vmem:[%s1249_s6 + $0x58] sm:$0xff] %vm208_vm0, %v634_v63  ;;  %653 = vst.msk [vmem:[%s1249_s6 + $0x70] sm:$0xff] %vm208_vm0, %v637_v3 }
 0x341   : > { %v614_v2 = vpop.permute.xlu1 %613 }
 0x342   : > { %v636_v16 = vmul.f32 %v614_v2, %v1165_v20 }
 0x344   : > { %652 = vst.msk [vmem:[%s1249_s6 + $0x68] sm:$0xff] %vm208_vm0, %v636_v16 }
 0x345   : > { %v622_v4 = vpop.permute.xlu1 %621 }
 0x346   : > { %v638_v12 = vmul.f32 %v622_v4, %v1185_v28 }
 0x348   : > { %654 = vst.msk [vmem:[%s1249_s6 + $0x78] sm:$0xff] %vm208_vm0, %v638_v12 }
 0x349   : > { %914 = shalt.err (!%p911_p2)
}
 0x34a   : > { %s915_s28 = scalar_lea.hbm %s1299_s19, 2048  ;;  %s919_s10 = scalar_lea.hbm %s1351_s3, 4096 }
 0x34b   : > { %p916_p4 = scmp.ne.s32.totalorder %s1299_s19, %s915_s28  ;;  %p920_p9 = scmp.lt.u32.totalorder %s1299_s19, %s1351_s3 }
 0x34c   : > { %p921_p1 = scmp.lt.u32.totalorder %s919_s10, %s915_s28  ;;  %p923_p6 = scmp.lt.u32.totalorder %s915_s28, %s1299_s19 }
 0x34d   : > { %p917_p5 = pnand %p916_p4, %p1358_p11 }
 0x34e   : > { %p922_p3 = por %p921_p1, %p920_p9 }
 0x34f   : > { %p918_p7 = pneg %p917_p5 }
 0x350   : > { %p924_p12 = por %p923_p6, %p922_p3 }
 0x352   : > { %p925_p13 = pnand %p924_p12, %p918_p7 }
 0x354   : > { %928 = shalt.err (!%p925_p13)
}
 0x355   : > { %s976_s4 = smov 128   ;;  %s977_s6 = smov 8  }
 0x356   : > { %816 = dma.vmem_to_hbm [thread:$0]  (%p1358_p11), %s1301_s7, 2048, %s1299_s19, %s656_s20, %s976_s4, %s976_s4, %s977_s6  }
 0x357 PF: > { %s685_s9 = sand.u32 1, %s955_s12   ;;  %p1359_p8 = scmp.ne.s32.totalorder %s1356_s25, 0 }
 0x358   : > { %p1360_p10 = scmp.ge.s32.totalorder %s967_s15, 2  ;;  %s686_s8 = scalar_lea.sflag [#allocation4], %s685_s9 }
 0x35a   : > { %p823_p0 = pnand %p1360_p10, %p1359_p8 }
 0x35c   : > { %950 = dma.done.wait (!%p823_p0), %s686_s8, 2048  }
 0x35d   : > { %952 = vsyncadd (!%p823_p0), %s686_s8, 4294965248  ;;  %p16_p2 = scmp.ge.s32.totalorder %s1023_s18, 4   ;;  %s1361_s12 = smov %s959_s13 }
 0x35e   : > { %s1362_s13 = smov %s963_s14  ;;  %s1363_s14 = smov %s1035_s21 }
 0x35f   : > { %s1364_s15 = smov %s1023_s18  ;;  %18 = sbr.rel (!%p16_p2) target bundleno = 5 (0x5), region = 77 }
 0x366   :  { %691 = vsyncpa [#allocation3], 1 }
 0x367   :  { %693 = vsyncpa [#allocation3 + $0x1], 1 }
 0x368   :  { %694 = vsyncpa [#allocation4], 1 }
 0x369   :  { %696 = vsyncpa [#allocation4 + $0x1], 1 }

</bundles_post_ra>
